<compile_context>
chip_gen: v5e
topology: v5e:2x2
jax: 0.10.0
libtpu: 0.0.40
codegen_flags: <defaults>
</compile_context>

<pallas_src>
import functools

import jax
import jax.numpy as jnp
from jax.experimental import pallas as pl
from jax.experimental.pallas import tpu as pltpu

LATENT_SIZE = 32
_TARGET_BLOCK_BYTES = 2 << 20            # ~2 MiB per streamed block
_VMEM_LIMIT_BYTES = 32 * 1024 * 1024     # 2 streams x 2 buffers x 2 MiB << 32 MiB


def _round_up(x, m):
    return ((x + m - 1) // m) * m


def _pack_factor(d):
    """Lane-dense packing factor k: (N, d) -> (N/k, k*d) with k*d == 128 lanes."""
    if d < 128 and 128 % d == 0:
        return 128 // d
    return 1


def _global_block_kernel(g_ref, e_ref, n_ref, w1_ref, w2_ref, out_ref,
                         acc_e_ref, acc_n_ref, vec_ref, *,
                         inv_edges, inv_nodes, k_e, k_n, dg, de, dn):
    step = pl.program_id(0)

    @pl.when(step == 0)
    def _init():
        acc_e_ref[...] = jnp.zeros_like(acc_e_ref)
        acc_n_ref[...] = jnp.zeros_like(acc_n_ref)
        # Constant pieces of collected = [global | mean(edges) | mean(nodes) | 1.0]
        # written once; the trailing 1.0 activates W1p's folded bias row and, via
        # ReLU(1)=1 in the spare 33rd column, W2p's folded bias row (b2).
        vec_ref[:, :dg] = g_ref[...].astype(jnp.float32)
        vec_ref[:, dg + de + dn:] = jnp.ones((1, 1), jnp.float32)

    # Steady state: unmasked, full-lane partial sums.  The wrapper zero-padded the
    # packed inputs to exactly num_steps * tile rows, so no iota/compare/select is
    # needed and padding rows contribute exactly 0 to the sums.
    acc_e_ref[...] += jnp.sum(e_ref[...], axis=0, keepdims=True, dtype=jnp.float32)
    acc_n_ref[...] += jnp.sum(n_ref[...], axis=0, keepdims=True, dtype=jnp.float32)

    @pl.when(step == pl.num_programs(0) - 1)
    def _finalize():
        # Fold the k lane-packed copies of each feature vector back to (1, d)
        # (static lane slices, unrolled; runs once per kernel), finish the mean,
        # then run the tiny folded-bias MLP: Linear -> ReLU -> Linear.
        acc_e = acc_e_ref[...]
        sum_e = acc_e[:, 0:de]
        for j in range(1, k_e):
            sum_e = sum_e + acc_e[:, j * de:(j + 1) * de]
        acc_n = acc_n_ref[...]
        sum_n = acc_n[:, 0:dn]
        for j in range(1, k_n):
            sum_n = sum_n + acc_n[:, j * dn:(j + 1) * dn]

        vec_ref[:, dg:dg + de] = sum_e * inv_edges
        vec_ref[:, dg + de:dg + de + dn] = sum_n * inv_nodes

        h = jnp.maximum(
            jnp.dot(vec_ref[...], w1_ref[...], preferred_element_type=jnp.float32),
            0.0)
        out_ref[...] = jnp.dot(
            h, w2_ref[...], preferred_element_type=jnp.float32).astype(out_ref.dtype)


def global_block_forward(node_attr, edge_attr, global_attr, params,
                         target_block_bytes=_TARGET_BLOCK_BYTES):
    """Returns the new global_attr, shape [1, out_features]."""
    w1p, w2p = params["w1p"], params["w2p"]
    num_nodes, dn = node_attr.shape
    num_edges, de = edge_attr.shape
    dg = global_attr.shape[1]
    if num_edges == 0 or num_nodes == 0:
        raise ValueError("GlobalBlock: mean over an empty edge/node set is undefined "
                         "(num_edges and num_nodes must be > 0).")

    in1 = dg + de + dn + 1                     # +1 for the folded-bias column
    lat1 = LATENT_SIZE + 1
    out_features = w2p.shape[1]

    # ---- lane-dense relayout: (N, d) -> (Np, k*d) with k*d == 128 when d | 128 ----
    k_e, k_n = _pack_factor(de), _pack_factor(dn)
    dpe, dpn = k_e * de, k_n * dn

    # ---- byte-budgeted row tiles, balanced so both streams finish together --------
    def _rows_per_block(d_packed, itemsize):
        return max(8, (target_block_bytes // (d_packed * itemsize)) // 8 * 8)

    np_e = pl.cdiv(num_edges, k_e)             # packed row counts (pre-pad)
    np_n = pl.cdiv(num_nodes, k_n)
    tr_e0 = _rows_per_block(dpe, edge_attr.dtype.itemsize)
    tr_n0 = _rows_per_block(dpn, node_attr.dtype.itemsize)
    num_steps = max(pl.cdiv(np_e, tr_e0), pl.cdiv(np_n, tr_n0), 1)
    tr_e = _round_up(pl.cdiv(np_e, num_steps), 8)
    tr_n = _round_up(pl.cdiv(np_n, num_steps), 8)

    # Zero-pad to exactly num_steps * tile packed rows so every grid step streams a
    # full, unmasked block (zero rows do not perturb the sums; the mean still divides
    # by the true num_edges / num_nodes).  Aligned inputs skip the pad entirely.
    def _pack(x, k, tr, n_rows, d):
        rows_padded = num_steps * tr * k
        if rows_padded != n_rows:
            x = jnp.pad(x, ((0, rows_padded - n_rows), (0, 0)))
        return x.reshape(num_steps * tr, k * d)

    edge_p = _pack(edge_attr, k_e, tr_e, num_edges, de)
    node_p = _pack(node_attr, k_n, tr_n, num_nodes, dn)

    kernel = functools.partial(
        _global_block_kernel,
        inv_edges=1.0 / num_edges, inv_nodes=1.0 / num_nodes,
        k_e=k_e, k_n=k_n, dg=dg, de=de, dn=dn)

    cost = pl.CostEstimate(
        flops=int(edge_p.size + node_p.size
                  + 2 * in1 * lat1 + 2 * lat1 * out_features),
        transcendentals=0,
        bytes_accessed=int(edge_p.size * edge_p.dtype.itemsize
                           + node_p.size * node_p.dtype.itemsize
                           + global_attr.size * global_attr.dtype.itemsize
                           + w1p.size * 4 + w2p.size * 4 + out_features * 4))

    grid_spec = pltpu.PrefetchScalarGridSpec(
        num_scalar_prefetch=0,
        grid=(num_steps,),
        in_specs=[
            # small operands: same block every step -> stay resident in VMEM
            pl.BlockSpec((1, dg), lambda i: (0, 0)),
            # streamed lane-dense row tiles (no clamps / no masking needed)
            pl.BlockSpec((tr_e, dpe), lambda i: (i, 0)),
            pl.BlockSpec((tr_n, dpn), lambda i: (i, 0)),
            pl.BlockSpec((in1, lat1), lambda i: (0, 0)),
            pl.BlockSpec((lat1, out_features), lambda i: (0, 0)),
        ],
        out_specs=pl.BlockSpec((1, out_features), lambda i: (0, 0)),
        scratch_shapes=[
            pltpu.VMEM((1, dpe), jnp.float32),   # lane-packed edge-sum accumulator
            pltpu.VMEM((1, dpn), jnp.float32),   # lane-packed node-sum accumulator
            pltpu.VMEM((1, in1), jnp.float32),   # collected [global|edges|nodes|1]
        ])

    return pl.pallas_call(
        kernel,
        out_shape=jax.ShapeDtypeStruct((1, out_features), jnp.float32),
        grid_spec=grid_spec,
        compiler_params=pltpu.CompilerParams(
            dimension_semantics=("arbitrary",),
            vmem_limit_bytes=_VMEM_LIMIT_BYTES),
        cost_estimate=cost,
    )(global_attr, edge_p, node_p, w1p, w2p)


def make_params(key, global_dim, edge_dim, node_dim, out_features):
    """Deterministic synthetic parameters for
       nn.Sequential(Linear(in_features, 32), ReLU(), Linear(32, out_features)),
       packed with their biases folded into the weight matrices."""
    in_features = global_dim + edge_dim + node_dim
    k1, k2, k3, k4 = jax.random.split(key, 4)
    s1 = 1.0 / jnp.sqrt(in_features)
    s2 = 1.0 / jnp.sqrt(LATENT_SIZE)
    w1 = jax.random.uniform(k1, (in_features, LATENT_SIZE), jnp.float32, -s1, s1)
    b1 = jax.random.uniform(k2, (LATENT_SIZE,), jnp.float32, -s1, s1)
    w2 = jax.random.uniform(k3, (LATENT_SIZE, out_features), jnp.float32, -s2, s2)
    b2 = jax.random.uniform(k4, (out_features,), jnp.float32, -s2, s2)

    # W1p = [[W1, 0], [b1, 1]]  (in_features+1, 33)
    # W2p = [[W2], [b2]]        (33, out_features)
    w1p = jnp.zeros((in_features + 1, LATENT_SIZE + 1), jnp.float32)
    w1p = w1p.at[:in_features, :LATENT_SIZE].set(w1)
    w1p = w1p.at[in_features, :LATENT_SIZE].set(b1)
    w1p = w1p.at[in_features, LATENT_SIZE].set(1.0)
    w2p = jnp.concatenate([w2, b2[None, :]], axis=0)

    return {"w1p": w1p, "w2p": w2p,
            # raw (unpacked) params kept only for the pure-JAX reference check
            "_w1": w1, "_b1": b1, "_w2": w2, "_b2": b2}


def reference_forward(node_attr, edge_attr, global_attr, params):
    agg_e = jnp.mean(edge_attr, axis=0, keepdims=True)
    agg_n = jnp.mean(node_attr, axis=0, keepdims=True)
    collected = jnp.concatenate([global_attr, agg_e, agg_n], axis=-1)
    h = jnp.maximum(collected @ params["_w1"] + params["_b1"][None, :], 0.0)
    return h @ params["_w2"] + params["_b2"][None, :]


if __name__ == "__main__":
    key = jax.random.PRNGKey(0)
    k_n, k_e, k_g, k_i, k_p = jax.random.split(key, 5)

    # Deliberately non-multiples of the pack factor (16) and tile size to exercise
    # the zero-pad + multi-step streamed-reduction paths.
    num_nodes, num_edges = 300, 777
    node_dim, edge_dim, global_dim = 8, 8, 4
    out_features = 16

    node_attr = jax.random.normal(k_n, (num_nodes, node_dim), jnp.float32)
    edge_attr = jax.random.normal(k_e, (num_edges, edge_dim), jnp.float32)
    global_attr = jax.random.normal(k_g, (1, global_dim), jnp.float32)
    # edge_index exists in the graph but GlobalBlock's reducer index is all-zeros,
    # so it is constructed but not used by the compute.
    edge_index = jax.random.randint(k_i, (2, num_edges), 0, num_nodes)

    params = make_params(k_p, global_dim, edge_dim, node_dim, out_features)
    ref = reference_forward(node_attr, edge_attr, global_attr, params)

    # (1) tiny block budget -> exercises the multi-step streamed reduction + padding.
    out_small = global_block_forward(node_attr, edge_attr, global_attr, params,
                                     target_block_bytes=4096)
    out_small = jax.block_until_ready(out_small)
    # (2) default MiB-scale block budget (single grid step at these sizes).
    out = global_block_forward(node_attr, edge_attr, global_attr, params)
    out = jax.block_until_ready(out)

    assert out.shape == (1, out_features)
    for o in (out_small, out):
        assert jnp.allclose(o, ref, atol=1e-4, rtol=1e-4), (
            f"max abs err {jnp.max(jnp.abs(o - ref))}")

    print("KERNEL_OK")
</pallas_src>

<mosaic_0001>
module attributes {stable_mosaic.version = 11 : i64} {
  func.func @_global_block_kernel(%arg0: i32, %arg1: memref<1x4xf32, #tpu.memory_space<vmem>>, %arg2: memref<8x128xf32, #tpu.memory_space<vmem>>, %arg3: memref<8x128xf32, #tpu.memory_space<vmem>>, %arg4: memref<21x33xf32, #tpu.memory_space<vmem>>, %arg5: memref<33x16xf32, #tpu.memory_space<vmem>>, %arg6: memref<1x16xf32, #tpu.memory_space<vmem>>, %arg7: memref<1x128xf32, #tpu.memory_space<vmem>>, %arg8: memref<1x128xf32, #tpu.memory_space<vmem>>, %arg9: memref<1x21xf32, #tpu.memory_space<vmem>>) attributes {dimension_semantics = [#tpu.dimension_semantics<arbitrary>], iteration_bounds = array<i64: 7>, scalar_prefetch = 0 : i64, scratch_operands = 3 : i64, tpu.core_type = #tpu.core_type<tc>, window_params = [{pipeline_mode = #tpu.pipeline_mode<synchronous>, transform_indices = @transform_0, window_bounds = array<i64: 1, 4>}, {transform_indices = @transform_1, window_bounds = array<i64: 8, 128>}, {transform_indices = @transform_2, window_bounds = array<i64: 8, 128>}, {pipeline_mode = #tpu.pipeline_mode<synchronous>, transform_indices = @transform_3, window_bounds = array<i64: 21, 33>}, {pipeline_mode = #tpu.pipeline_mode<synchronous>, transform_indices = @transform_4, window_bounds = array<i64: 33, 16>}, {pipeline_mode = #tpu.pipeline_mode<synchronous>, transform_indices = @transform_5, window_bounds = array<i64: 1, 16>}]} {
    %c0_i32 = arith.constant 0 : i32
    %0 = arith.cmpi eq, %arg0, %c0_i32 : i32
    %1 = arith.extui %0 : i1 to i32
    %c0_i32_0 = arith.constant 0 : i32
    %2 = arith.cmpi ne, %1, %c0_i32_0 : i32
    scf.if %2 {
      %cst_14 = arith.constant 0.000000e+00 : f32
      %18 = vector.broadcast %cst_14 : f32 to vector<1x128xf32>
      %c0_15 = arith.constant 0 : index
      %c0_16 = arith.constant 0 : index
      %19 = vector.load %arg7[%c0_15, %c0_16] : memref<1x128xf32, #tpu.memory_space<vmem>>, vector<1x128xf32>
      tpu.vector_store %arg7[%c0_15, %c0_16], %18 {strides = array<i32>} : memref<1x128xf32, #tpu.memory_space<vmem>>, vector<1x128xf32>,
      %cst_17 = arith.constant 0.000000e+00 : f32
      %20 = vector.broadcast %cst_17 : f32 to vector<1x128xf32>
      %c0_18 = arith.constant 0 : index
      %c0_19 = arith.constant 0 : index
      %21 = vector.load %arg8[%c0_18, %c0_19] : memref<1x128xf32, #tpu.memory_space<vmem>>, vector<1x128xf32>
      tpu.vector_store %arg8[%c0_18, %c0_19], %20 {strides = array<i32>} : memref<1x128xf32, #tpu.memory_space<vmem>>, vector<1x128xf32>,
      %c0_20 = arith.constant 0 : index
      %c0_21 = arith.constant 0 : index
      %22 = vector.load %arg1[%c0_20, %c0_21] : memref<1x4xf32, #tpu.memory_space<vmem>>, vector<1x4xf32>
      %c0_22 = arith.constant 0 : index
      %c0_23 = arith.constant 0 : index
      %23 = vector.load %arg9[%c0_22, %c0_23] : memref<1x21xf32, #tpu.memory_space<vmem>>, vector<1x4xf32>
      tpu.vector_store %arg9[%c0_22, %c0_23], %22 {strides = array<i32>} : memref<1x21xf32, #tpu.memory_space<vmem>>, vector<1x4xf32>,
      %cst_24 = arith.constant 1.000000e+00 : f32
      %24 = vector.broadcast %cst_24 : f32 to vector<1x1xf32>
      %c0_25 = arith.constant 0 : index
      %c20 = arith.constant 20 : index
      %25 = vector.load %arg9[%c0_25, %c20] : memref<1x21xf32, #tpu.memory_space<vmem>>, vector<1x1xf32>
      tpu.vector_store %arg9[%c0_25, %c20], %24 {strides = array<i32>} : memref<1x21xf32, #tpu.memory_space<vmem>>, vector<1x1xf32>,
    } else {
    }
    %c0 = arith.constant 0 : index
    %c0_1 = arith.constant 0 : index
    %3 = vector.load %arg7[%c0, %c0_1] : memref<1x128xf32, #tpu.memory_space<vmem>>, vector<1x128xf32>
    %c0_2 = arith.constant 0 : index
    %c0_3 = arith.constant 0 : index
    %4 = vector.load %arg2[%c0_2, %c0_3] : memref<8x128xf32, #tpu.memory_space<vmem>>, vector<8x128xf32>
    %cst = arith.constant dense<0.000000e+00> : vector<128xf32>
    %5 = vector.multi_reduction <add>, %4, %cst [0] : vector<8x128xf32> to vector<128xf32>
    %6 = vector.shape_cast %5 : vector<128xf32> to vector<1x128xf32>
    %7 = arith.addf %3, %6 : vector<1x128xf32>
    %c0_4 = arith.constant 0 : index
    %c0_5 = arith.constant 0 : index
    %8 = vector.load %arg7[%c0_4, %c0_5] : memref<1x128xf32, #tpu.memory_space<vmem>>, vector<1x128xf32>
    tpu.vector_store %arg7[%c0_4, %c0_5], %7 {strides = array<i32>} : memref<1x128xf32, #tpu.memory_space<vmem>>, vector<1x128xf32>,
    %c0_6 = arith.constant 0 : index
    %c0_7 = arith.constant 0 : index
    %9 = vector.load %arg8[%c0_6, %c0_7] : memref<1x128xf32, #tpu.memory_space<vmem>>, vector<1x128xf32>
    %c0_8 = arith.constant 0 : index
    %c0_9 = arith.constant 0 : index
    %10 = vector.load %arg3[%c0_8, %c0_9] : memref<8x128xf32, #tpu.memory_space<vmem>>, vector<8x128xf32>
    %cst_10 = arith.constant dense<0.000000e+00> : vector<128xf32>
    %11 = vector.multi_reduction <add>, %10, %cst_10 [0] : vector<8x128xf32> to vector<128xf32>
    %12 = vector.shape_cast %11 : vector<128xf32> to vector<1x128xf32>
    %13 = arith.addf %9, %12 : vector<1x128xf32>
    %c0_11 = arith.constant 0 : index
    %c0_12 = arith.constant 0 : index
    %14 = vector.load %arg8[%c0_11, %c0_12] : memref<1x128xf32, #tpu.memory_space<vmem>>, vector<1x128xf32>
    tpu.vector_store %arg8[%c0_11, %c0_12], %13 {strides = array<i32>} : memref<1x128xf32, #tpu.memory_space<vmem>>, vector<1x128xf32>,
    %c6_i32 = arith.constant 6 : i32
    %15 = arith.cmpi eq, %arg0, %c6_i32 : i32
    %16 = arith.extui %15 : i1 to i32
    %c0_i32_13 = arith.constant 0 : i32
    %17 = arith.cmpi ne, %16, %c0_i32_13 : i32
    scf.if %17 {
      %c0_14 = arith.constant 0 : index
      %c0_15 = arith.constant 0 : index
      %18 = vector.load %arg7[%c0_14, %c0_15] : memref<1x128xf32, #tpu.memory_space<vmem>>, vector<1x128xf32>
      %19 = vector.extract_strided_slice %18 {offsets = [0, 0], sizes = [1, 8], strides = [1, 1]} : vector<1x128xf32> to vector<1x8xf32>
      %20 = vector.extract_strided_slice %18 {offsets = [0, 8], sizes = [1, 8], strides = [1, 1]} : vector<1x128xf32> to vector<1x8xf32>
      %21 = arith.addf %19, %20 : vector<1x8xf32>
      %22 = vector.extract_strided_slice %18 {offsets = [0, 16], sizes = [1, 8], strides = [1, 1]} : vector<1x128xf32> to vector<1x8xf32>
      %23 = arith.addf %21, %22 : vector<1x8xf32>
      %24 = vector.extract_strided_slice %18 {offsets = [0, 24], sizes = [1, 8], strides = [1, 1]} : vector<1x128xf32> to vector<1x8xf32>
      %25 = arith.addf %23, %24 : vector<1x8xf32>
      %26 = vector.extract_strided_slice %18 {offsets = [0, 32], sizes = [1, 8], strides = [1, 1]} : vector<1x128xf32> to vector<1x8xf32>
      %27 = arith.addf %25, %26 : vector<1x8xf32>
      %28 = vector.extract_strided_slice %18 {offsets = [0, 40], sizes = [1, 8], strides = [1, 1]} : vector<1x128xf32> to vector<1x8xf32>
      %29 = arith.addf %27, %28 : vector<1x8xf32>
      %30 = vector.extract_strided_slice %18 {offsets = [0, 48], sizes = [1, 8], strides = [1, 1]} : vector<1x128xf32> to vector<1x8xf32>
      %31 = arith.addf %29, %30 : vector<1x8xf32>
      %32 = vector.extract_strided_slice %18 {offsets = [0, 56], sizes = [1, 8], strides = [1, 1]} : vector<1x128xf32> to vector<1x8xf32>
      %33 = arith.addf %31, %32 : vector<1x8xf32>
      %34 = vector.extract_strided_slice %18 {offsets = [0, 64], sizes = [1, 8], strides = [1, 1]} : vector<1x128xf32> to vector<1x8xf32>
      %35 = arith.addf %33, %34 : vector<1x8xf32>
      %36 = vector.extract_strided_slice %18 {offsets = [0, 72], sizes = [1, 8], strides = [1, 1]} : vector<1x128xf32> to vector<1x8xf32>
      %37 = arith.addf %35, %36 : vector<1x8xf32>
      %38 = vector.extract_strided_slice %18 {offsets = [0, 80], sizes = [1, 8], strides = [1, 1]} : vector<1x128xf32> to vector<1x8xf32>
      %39 = arith.addf %37, %38 : vector<1x8xf32>
      %40 = vector.extract_strided_slice %18 {offsets = [0, 88], sizes = [1, 8], strides = [1, 1]} : vector<1x128xf32> to vector<1x8xf32>
      %41 = arith.addf %39, %40 : vector<1x8xf32>
      %42 = vector.extract_strided_slice %18 {offsets = [0, 96], sizes = [1, 8], strides = [1, 1]} : vector<1x128xf32> to vector<1x8xf32>
      %43 = arith.addf %41, %42 : vector<1x8xf32>
      %44 = vector.extract_strided_slice %18 {offsets = [0, 104], sizes = [1, 8], strides = [1, 1]} : vector<1x128xf32> to vector<1x8xf32>
      %45 = arith.addf %43, %44 : vector<1x8xf32>
      %46 = vector.extract_strided_slice %18 {offsets = [0, 112], sizes = [1, 8], strides = [1, 1]} : vector<1x128xf32> to vector<1x8xf32>
      %47 = arith.addf %45, %46 : vector<1x8xf32>
      %48 = vector.extract_strided_slice %18 {offsets = [0, 120], sizes = [1, 8], strides = [1, 1]} : vector<1x128xf32> to vector<1x8xf32>
      %49 = arith.addf %47, %48 : vector<1x8xf32>
      %c0_16 = arith.constant 0 : index
      %c0_17 = arith.constant 0 : index
      %50 = vector.load %arg8[%c0_16, %c0_17] : memref<1x128xf32, #tpu.memory_space<vmem>>, vector<1x128xf32>
      %51 = vector.extract_strided_slice %50 {offsets = [0, 0], sizes = [1, 8], strides = [1, 1]} : vector<1x128xf32> to vector<1x8xf32>
      %52 = vector.extract_strided_slice %50 {offsets = [0, 8], sizes = [1, 8], strides = [1, 1]} : vector<1x128xf32> to vector<1x8xf32>
      %53 = arith.addf %51, %52 : vector<1x8xf32>
      %54 = vector.extract_strided_slice %50 {offsets = [0, 16], sizes = [1, 8], strides = [1, 1]} : vector<1x128xf32> to vector<1x8xf32>
      %55 = arith.addf %53, %54 : vector<1x8xf32>
      %56 = vector.extract_strided_slice %50 {offsets = [0, 24], sizes = [1, 8], strides = [1, 1]} : vector<1x128xf32> to vector<1x8xf32>
      %57 = arith.addf %55, %56 : vector<1x8xf32>
      %58 = vector.extract_strided_slice %50 {offsets = [0, 32], sizes = [1, 8], strides = [1, 1]} : vector<1x128xf32> to vector<1x8xf32>
      %59 = arith.addf %57, %58 : vector<1x8xf32>
      %60 = vector.extract_strided_slice %50 {offsets = [0, 40], sizes = [1, 8], strides = [1, 1]} : vector<1x128xf32> to vector<1x8xf32>
      %61 = arith.addf %59, %60 : vector<1x8xf32>
      %62 = vector.extract_strided_slice %50 {offsets = [0, 48], sizes = [1, 8], strides = [1, 1]} : vector<1x128xf32> to vector<1x8xf32>
      %63 = arith.addf %61, %62 : vector<1x8xf32>
      %64 = vector.extract_strided_slice %50 {offsets = [0, 56], sizes = [1, 8], strides = [1, 1]} : vector<1x128xf32> to vector<1x8xf32>
      %65 = arith.addf %63, %64 : vector<1x8xf32>
      %66 = vector.extract_strided_slice %50 {offsets = [0, 64], sizes = [1, 8], strides = [1, 1]} : vector<1x128xf32> to vector<1x8xf32>
      %67 = arith.addf %65, %66 : vector<1x8xf32>
      %68 = vector.extract_strided_slice %50 {offsets = [0, 72], sizes = [1, 8], strides = [1, 1]} : vector<1x128xf32> to vector<1x8xf32>
      %69 = arith.addf %67, %68 : vector<1x8xf32>
      %70 = vector.extract_strided_slice %50 {offsets = [0, 80], sizes = [1, 8], strides = [1, 1]} : vector<1x128xf32> to vector<1x8xf32>
      %71 = arith.addf %69, %70 : vector<1x8xf32>
      %72 = vector.extract_strided_slice %50 {offsets = [0, 88], sizes = [1, 8], strides = [1, 1]} : vector<1x128xf32> to vector<1x8xf32>
      %73 = arith.addf %71, %72 : vector<1x8xf32>
      %74 = vector.extract_strided_slice %50 {offsets = [0, 96], sizes = [1, 8], strides = [1, 1]} : vector<1x128xf32> to vector<1x8xf32>
      %75 = arith.addf %73, %74 : vector<1x8xf32>
      %76 = vector.extract_strided_slice %50 {offsets = [0, 104], sizes = [1, 8], strides = [1, 1]} : vector<1x128xf32> to vector<1x8xf32>
      %77 = arith.addf %75, %76 : vector<1x8xf32>
      %78 = vector.extract_strided_slice %50 {offsets = [0, 112], sizes = [1, 8], strides = [1, 1]} : vector<1x128xf32> to vector<1x8xf32>
      %79 = arith.addf %77, %78 : vector<1x8xf32>
      %80 = vector.extract_strided_slice %50 {offsets = [0, 120], sizes = [1, 8], strides = [1, 1]} : vector<1x128xf32> to vector<1x8xf32>
      %81 = arith.addf %79, %80 : vector<1x8xf32>
      %cst_18 = arith.constant 0.0012870013 : f32
      %82 = vector.broadcast %cst_18 : f32 to vector<1x8xf32>
      %83 = arith.mulf %49, %82 : vector<1x8xf32>
      %c0_19 = arith.constant 0 : index
      %c4 = arith.constant 4 : index
      %84 = vector.load %arg9[%c0_19, %c4] : memref<1x21xf32, #tpu.memory_space<vmem>>, vector<1x8xf32>
      tpu.vector_store %arg9[%c0_19, %c4], %83 {strides = array<i32>} : memref<1x21xf32, #tpu.memory_space<vmem>>, vector<1x8xf32>,
      %cst_20 = arith.constant 0.00333333341 : f32
      %85 = vector.broadcast %cst_20 : f32 to vector<1x8xf32>
      %86 = arith.mulf %81, %85 : vector<1x8xf32>
      %c0_21 = arith.constant 0 : index
      %c12 = arith.constant 12 : index
      %87 = vector.load %arg9[%c0_21, %c12] : memref<1x21xf32, #tpu.memory_space<vmem>>, vector<1x8xf32>
      tpu.vector_store %arg9[%c0_21, %c12], %86 {strides = array<i32>} : memref<1x21xf32, #tpu.memory_space<vmem>>, vector<1x8xf32>,
      %c0_22 = arith.constant 0 : index
      %c0_23 = arith.constant 0 : index
      %88 = vector.load %arg9[%c0_22, %c0_23] : memref<1x21xf32, #tpu.memory_space<vmem>>, vector<1x21xf32>
      %c0_24 = arith.constant 0 : index
      %c0_25 = arith.constant 0 : index
      %89 = vector.load %arg4[%c0_24, %c0_25] : memref<21x33xf32, #tpu.memory_space<vmem>>, vector<21x33xf32>
      %cst_26 = arith.constant dense<0.000000e+00> : vector<1x33xf32>
      %90 = tpu.matmul %88, %89, %cst_26 {dimension_numbers = #tpu.dot_dimension_numbers<[1], [0], [0], [1], [0, 0, 1, 1], [], []>} : vector<1x21xf32>, vector<21x33xf32>, vector<1x33xf32> -> vector<1x33xf32>
      %cst_27 = arith.constant 0.000000e+00 : f32
      %91 = vector.broadcast %cst_27 : f32 to vector<1x33xf32>
      %92 = arith.maximumf %90, %91 : vector<1x33xf32>
      %c0_28 = arith.constant 0 : index
      %c0_29 = arith.constant 0 : index
      %93 = vector.load %arg5[%c0_28, %c0_29] : memref<33x16xf32, #tpu.memory_space<vmem>>, vector<33x16xf32>
      %cst_30 = arith.constant dense<0.000000e+00> : vector<1x16xf32>
      %94 = tpu.matmul %92, %93, %cst_30 {dimension_numbers = #tpu.dot_dimension_numbers<[1], [0], [0], [1], [0, 0, 1, 1], [], []>} : vector<1x33xf32>, vector<33x16xf32>, vector<1x16xf32> -> vector<1x16xf32>
      %c0_31 = arith.constant 0 : index
      %c0_32 = arith.constant 0 : index
      %95 = vector.load %arg6[%c0_31, %c0_32] : memref<1x16xf32, #tpu.memory_space<vmem>>, vector<1x16xf32>
      tpu.vector_store %arg6[%c0_31, %c0_32], %94 {strides = array<i32>} : memref<1x16xf32, #tpu.memory_space<vmem>>, vector<1x16xf32>,
    } else {
    }
    return
  }
  func.func @transform_0(%arg0: i32) -> (i32, i32) {
    %c0_i32 = arith.constant 0 : i32
    %c0_i32_0 = arith.constant 0 : i32
    %c0_i32_1 = arith.constant 0 : i32
    return %c0_i32, %c0_i32_0 : i32, i32
  }
  func.func @transform_1(%arg0: i32) -> (i32, i32) {
    %c0_i32 = arith.constant 0 : i32
    %c0_i32_0 = arith.constant 0 : i32
    return %arg0, %c0_i32 : i32, i32
  }
  func.func @transform_2(%arg0: i32) -> (i32, i32) {
    %c0_i32 = arith.constant 0 : i32
    %c0_i32_0 = arith.constant 0 : i32
    return %arg0, %c0_i32 : i32, i32
  }
  func.func @transform_3(%arg0: i32) -> (i32, i32) {
    %c0_i32 = arith.constant 0 : i32
    %c0_i32_0 = arith.constant 0 : i32
    %c0_i32_1 = arith.constant 0 : i32
    return %c0_i32, %c0_i32_0 : i32, i32
  }
  func.func @transform_4(%arg0: i32) -> (i32, i32) {
    %c0_i32 = arith.constant 0 : i32
    %c0_i32_0 = arith.constant 0 : i32
    %c0_i32_1 = arith.constant 0 : i32
    return %c0_i32, %c0_i32_0 : i32, i32
  }
  func.func @transform_5(%arg0: i32) -> (i32, i32) {
    %c0_i32 = arith.constant 0 : i32
    %c0_i32_0 = arith.constant 0 : i32
    %c0_i32_1 = arith.constant 0 : i32
    return %c0_i32, %c0_i32_0 : i32, i32
  }
}

</mosaic_0001>

<bundles_post_ra>
// kernel: tpu_custom_call.1
= control target key start
LH: loop header
LB: loop body
LE: loop exit
PB: predicated region body
PF: predicated region fallthrough
CT: control target
= control target key end

     0   :  { %10 = vsyncpa [#allocation6], 0  ;;  %s1101_s0 = inlined_call_operand.hbm [shape: f32[1,4], index: 0, kind: input, shape index: {}]   ;;  %s1102_s1 = inlined_call_operand.vmem [shape: f32[56,128], index: 1, kind: input, shape index: {}]   ;;  %s1103_s2 = inlined_call_operand.hbm [shape: f32[56,128], index: 2, kind: input, shape index: {}]   ;;  %s1104_s3 = inlined_call_operand.hbm [shape: f32[21,33], index: 3, kind: input, shape index: {}]   ;;  %s1105_s4 = inlined_call_operand.vmem [shape: f32[33,16], index: 4, kind: input, shape index: {}]   ;;  %s1106_s5 = inlined_call_operand.hbm [shape: f32[1,16], index: 5, kind: output, shape index: {}]  }
   0x1   :  { %11 = vsyncpa [#allocation9], 0 }
   0x2   :  { %13 = vsyncpa [#allocation9 + $0x1], 0 }
   0x3   :  { %14 = vsyncpa [#allocation7], 0  ;;  %s943_s18 = smov 0   ;;  %s945_s19 = smov 0  }
   0x4   :  { %s947_s20 = smov 0   ;;  %s949_s21 = smov 0  }
   0x5 LB: > { %s184_s24 = sshll.u32 %s1104_s3, 4  ;;  %s967_s25 = sadd.s32 4294967295, %s887_s21   ;;  %s887_s21 = sphi %s949_s21, %s1113_s21   ;;  %s883_s20 = sphi %s947_s20, %s1112_s20   ;;  %s879_s19 = sphi %s945_s19, %s1111_s19   ;;  %s875_s18 = sphi %s943_s18, %s1110_s18   ;;  %s185_s24 = int_to_ptr.hbm [resolvable:$true] %s184_s24 }
   0x6   : > { %p614_p0 = scmp.ge.s32.totalorder %s887_s21, 1  ;;  %p88_p1 = scmp.eq.s32.totalorder %s967_s25, 0 }
   0x7   : > { %p161_p2 = scmp.lt.s32.totalorder %s887_s21, 8  ;;  %p615_p3 = scmp.ne.s32.totalorder %s967_s25, 0 }
   0x8   : > { %s889_s27 = smov [#allocation10]   ;;  %s173_s6 = sshll.u32 %s1101_s0, 4  ;;  %s174_s6 = int_to_ptr.hbm [resolvable:$true] %s173_s6 }
   0x9   : > { %p973_p4 = pnand %p614_p0, %p161_p2  ;;  %s186_s28 = sshll.u32 %s889_s27, 4  ;;  %s187_s28 = int_to_ptr.vmem [resolvable:$true] %s186_s28 }
   0xa   : > { %s890_s7 = smov [#allocation5]   ;;  %s891_s9 = smov 128  }
   0xb   : > { %p649_p5 = pneg %p973_p4  ;;  %s175_s8 = sshll.u32 %s890_s7, 4  ;;  %s176_s8 = int_to_ptr.vmem [resolvable:$true] %s175_s8 }
   0xc   : > { %s892_s10 = smov 8   ;;  %s985_s11 = sadd.s32 1, %s887_s21  }
   0xd   : > { %p650_p6 = pnand %p649_p5, %p88_p1  ;;  %s74_s12 = sadd.s32 1, %s883_s20 }
   0xe   : > { %s71_s13 = ssub.s32 %s887_s21, %s985_s11  ;;  %p81_p7 = scmp.ne.s32.totalorder %s883_s20, %s879_s19 }
   0xf   : > { %655 = dma.hbm_to_vmem [thread:$0]  (!%p650_p6), %s185_s24, 384, %s187_s28, [#allocation9], %s891_s9, %s891_s9, %s892_s10  }
  0x10   : > { %652 = dma.hbm_to_vmem [thread:$0]  (!%p650_p6), %s174_s6, 16, %s176_s8, [#allocation6]  }
  0x11   : > { %p72_p8 = scmp.eq.s32.totalorder %s71_s13, 0  ;;  %p82_p9 = scmp.eq.s32.totalorder %s887_s21, 0 }
  0x12   : > { %p87_p10 = scmp.ne.s32.totalorder %s879_s19, %s875_s18  ;;  %p662_p11 = scmp.lt.s32.totalorder %s887_s21, 7 }
  0x13   : > { %s997_s14 = scalar_select %p72_p8, %s883_s20, %s74_s12  }
  0x14   : > { %p83_p12 = por %p82_p9, %p81_p7  ;;  %p1001_p13 = por %p88_p1, %p87_p10 }
  0x15   : > { %s210_s16 = sand.u32 1, %s887_s21   ;;  %s212_s17 = sand.u32 1, %s883_s20  }
  0x16   : > { %s618_s22 = sshll.u32 %s212_s17, 3  ;;  %s619_s23 = sshll.u32 %s887_s21, 3 }
  0x17   : > { %s218_s28 = scalar_lea.hbm %s1103_s2, %s619_s23  ;;  %s214_s29 = scalar_lea.vmem [#allocation8], %s618_s22 }
  0x18   : > { %s222_s30 = sshll.u32 %s214_s29, 4  ;;  %s220_s18 = sshll.u32 %s218_s28, 4  ;;  %s223_s30 = int_to_ptr.vmem [resolvable:$true] %s222_s30  ;;  %s221_s18 = int_to_ptr.hbm [resolvable:$true] %s220_s18 }
  0x19   : > { %p1013_p0 = pnand %p662_p11, %p83_p12  ;;  %s211_s7 = scalar_lea.sflag [#allocation9], %s210_s16 }
  0x1a   : > { %s783_s8 = sshra.s32 %s221_s18, 4  ;;  %s790_s13 = scalar_lea.hbm %s1103_s2, 56  ;;  %s784_s8 = int_to_ptr.hbm [resolvable:$true] %s783_s8 }
  0x1b   : > { %s785_s9 = scalar_lea.hbm %s784_s8, 8  ;;  %p787_p5 = pneg %p1013_p0 }
  0x1c   : > { %p786_p2 = scmp.ne.s32.totalorder %s784_s8, %s785_s9  ;;  %p791_p8 = scmp.lt.s32.totalorder %s784_s8, %s1103_s2 }
  0x1d   : > { %p792_p9 = scmp.lt.s32.totalorder %s790_s13, %s785_s9 }
  0x1e   : > { %p788_p6 = pnand %p787_p5, %p786_p2 }
  0x1f   : > { %p793_p10 = por %p792_p9, %p791_p8 }
  0x20   : > { %p789_p7 = pneg %p788_p6 }
  0x22   : > { %p794_p11 = pnand %p793_p10, %p789_p7 }
  0x24   : > { %797 = shalt.err (!%p794_p11)
}
  0x25   : > { %659 = dma.hbm_to_vmem [thread:$0]  (!%p1013_p0), %s221_s18, 128, %s223_s30, %s211_s7  }
  0x26   : > { %231 = sbr.rel (%p973_p4) target bundleno = 662 (0x296), region = 40 }
  0x2b   : > { %858 = dma.done.wait (%p88_p1), [#allocation6], 16  }
  0x2c   : > { %860 = vsyncadd (%p88_p1), [#allocation6], 4294967280  ;;  %s238_s16 = sand.u32 1, %s967_s25   ;;  %s240_s22 = sand.u32 1, %s879_s19  }
  0x2d   : > { %s622_s23 = sshll.u32 %s240_s22, 3  ;;  %s239_s24 = scalar_lea.sflag [#allocation9], %s238_s16 }
  0x2e   : > { %s242_s27 = scalar_lea.vmem [#allocation8], %s622_s23 }
  0x2f   : > { %862 = dma.done.wait (%p1001_p13), %s239_s24, 128  }
  0x30   : > { %864 = vsyncadd (%p1001_p13), %s239_s24, 4294967168 }
  0x31   : > { %866 = dma.done.wait (%p88_p1), [#allocation9], 384  }
  0x32   : > { %868 = vsyncadd (%p88_p1), [#allocation9], 4294966912  ;;  %p274_p4 = scmp.lt.s32.totalorder %s967_s25, 6 }
  0x33   : > { %281 = sbr.rel (%p615_p3) target bundleno = 61 (0x3d), region = 56 }
  0x34   : > { %s275_s26 = scalar_select %p274_p4, %s967_s25, 6 }
  0x36   : > { %s624_s28 = sshll.u32 %s275_s26, 3 }
  0x37   : > { %s277_s18 = scalar_lea.vmem %s1102_s1, %s624_s28 }
  0x38   : > { %v284_v0 = vld [vmem:[#allocation5] sm:$0x1]  ;;  %vm285_vm0 = vcmask 24576   ;;  %vm287_vm1 = vcmask 164000   ;;  %v893_v1 = vmov 0.0   ;;  %v894_v2 = vmov 1.0  }
  0x39   : > { %286 = vst.msk [vmem:[#allocation4] sm:$0x1] %vm285_vm0, %v284_v0 }
  0x3a   : > { %282 = vst [vmem:[#allocation2] sm:$0x1] %v893_v1 }
  0x3b   : > { %283 = vst [vmem:[#allocation3] sm:$0x1] %v893_v1 }
  0x3c   : > { %288 = vst.msk [vmem:[#allocation4] sm:$0x1] %vm287_vm1, %v894_v2 }
  0x3d PF: > { %v290_v3 = vld [vmem:[%s277_s18] sm:$0xff]  ;;  %p626_p1 = scmp.ne.s32.totalorder %s967_s25, 6 }
  0x3e   : > { %v291_v4 = vrot.slane %v290_v3, 4  ;;  %v300_v5 = vld [vmem:[%s242_s27] sm:$0xff]  ;;  %s895_s15 = smov (!%p626_p1), 112   ;;  %s896_s6 = smov (!%p626_p1), 120  }
  0x3f   : > { %v301_v6 = vrot.slane %v300_v5, 4  ;;  %s897_s7 = smov (!%p626_p1), 104   ;;  %s898_s8 = smov (!%p626_p1), 96  }
  0x40   : > { %v292_v7 = vadd.f32 %v291_v4, %v290_v3  ;;  %s899_s9 = smov (!%p626_p1), 88   ;;  %s900_s10 = smov (!%p626_p1), 80  }
  0x41   : > { %v302_v8 = vadd.f32 %v301_v6, %v300_v5  ;;  %v289_v14 = vld [vmem:[#allocation2] sm:$0x1]  ;;  %s901_s12 = smov (!%p626_p1), 72   ;;  %s902_s13 = smov (!%p626_p1), 64  }
  0x42   : > { %v293_v9 = vrot.slane %v292_v7, 2  ;;  %v299_v17 = vld [vmem:[#allocation3] sm:$0x1]  ;;  %s903_s17 = smov (!%p626_p1), 56   ;;  %s904_s21 = smov (!%p626_p1), 48  }
  0x43   : > { %v303_v10 = vrot.slane %v302_v8, 2  ;;  %s905_s16 = smov (!%p626_p1), 40   ;;  %s906_s22 = smov (!%p626_p1), 32  }
  0x44   : > { %v294_v11 = vadd.f32 %v293_v9, %v292_v7  ;;  %s907_s23 = smov (!%p626_p1), 24   ;;  %s908_s24 = smov (!%p626_p1), 16  }
  0x45   : > { %v304_v12 = vadd.f32 %v303_v10, %v302_v8  ;;  %s909_s27 = smov (!%p626_p1), 8   ;;  %s910_s26 = smov (!%p626_p1), 4  }
  0x46   : > { %v295_v13 = vrot.slane %v294_v11, 1  ;;  %s911_s28 = smov (!%p626_p1), 12  }
  0x47   : > { %v305_v15 = vrot.slane %v304_v12, 1 }
  0x48   : > { %v296_v16 = vadd.f32 %v295_v13, %v294_v11 }
  0x49   : > { %v306_v18 = vadd.f32 %v305_v15, %v304_v12  ;;  %312 = sbr.rel (%p626_p1) target bundleno = 657 (0x291), region = 60 }
  0x4a   : > { %v297_v19 = vadd.f32 %v296_v16, %v289_v14 }
  0x4b   : > { %v307_v20 = vadd.f32 %v306_v18, %v299_v17 }
  0x4c   : > { %298 = vst [vmem:[#allocation2] sm:$0x1] %v297_v19 }
  0x4d   : > { %308 = vst [vmem:[#allocation3] sm:$0x1] %v307_v20 }
  0x4e   : > { %vm461_vm2 = vcmask 1044480   ;;  %vm495_vm3 = vcmask 1040384   ;;  %vm443_vm4 = vcmask 90144   ;;  %vm451_vm5 = vcmask 155744  }
  0x4f   : > { %vm457_vm6 = vcmask 171008   ;;  %vm491_vm7 = vcmask 269312   ;;  %vm519_vm8 = vcmask 122880  }
  0x53   : > { %v1051_v21 = vld [vmem:[#allocation2] sm:$0x1] }
  0x54   : > { %319 = vrot.lane.b32.xlu1 %v1051_v21, %s895_s15  ;;  %315 = vrot.lane.b32.xlu0 %v1051_v21, %s896_s6  ;;  %v375_v22 = vld [vmem:[#allocation3] sm:$0x1] }
  0x55   : > { %323 = vrot.lane.b32.xlu2 %v1051_v21, %s897_s7 }
  0x5c   : > { %381 = vrot.lane.b32.xlu1 %v375_v22, %s895_s15  ;;  %377 = vrot.lane.b32.xlu0 %v375_v22, %s896_s6 }
  0x5d   : > { %385 = vrot.lane.b32.xlu2 %v375_v22, %s897_s7 }
  0x64   : > { %389 = vrot.lane.b32.xlu1 %v375_v22, %s898_s8  ;;  %327 = vrot.lane.b32.xlu0 %v1051_v21, %s898_s8 }
  0x65   : > { %331 = vrot.lane.b32.xlu2 %v1051_v21, %s899_s9 }
  0x6c   : > { %335 = vrot.lane.b32.xlu1 %v1051_v21, %s900_s10  ;;  %393 = vrot.lane.b32.xlu0 %v375_v22, %s899_s9 }
  0x6d   : > { %397 = vrot.lane.b32.xlu2 %v375_v22, %s900_s10 }
  0x74   : > { %401 = vrot.lane.b32.xlu1 %v375_v22, %s901_s12  ;;  %339 = vrot.lane.b32.xlu0 %v1051_v21, %s901_s12 }
  0x75   : > { %343 = vrot.lane.b32.xlu2 %v1051_v21, %s902_s13 }
  0x7c   : > { %347 = vrot.lane.b32.xlu1 %v1051_v21, %s903_s17  ;;  %405 = vrot.lane.b32.xlu0 %v375_v22, %s902_s13 }
  0x7d   : > { %409 = vrot.lane.b32.xlu2 %v375_v22, %s903_s17 }
  0x84   : > { %413 = vrot.lane.b32.xlu1 %v375_v22, %s904_s21  ;;  %351 = vrot.lane.b32.xlu0 %v1051_v21, %s904_s21 }
  0x85   : > { %355 = vrot.lane.b32.xlu2 %v1051_v21, %s905_s16 }
  0x8c   : > { %359 = vrot.lane.b32.xlu1 %v1051_v21, %s906_s22  ;;  %417 = vrot.lane.b32.xlu0 %v375_v22, %s905_s16 }
  0x8d   : > { %421 = vrot.lane.b32.xlu2 %v375_v22, %s906_s22 }
  0x94   : > { %425 = vrot.lane.b32.xlu1 %v375_v22, %s907_s23  ;;  %363 = vrot.lane.b32.xlu0 %v1051_v21, %s907_s23 }
  0x95   : > { %367 = vrot.lane.b32.xlu2 %v1051_v21, %s908_s24 }
  0x9c   : > { %371 = vrot.lane.b32.xlu1 %v1051_v21, %s909_s27  ;;  %429 = vrot.lane.b32.xlu0 %v375_v22, %s908_s24 }
  0x9d   : > { %433 = vrot.lane.b32.xlu2 %v375_v22, %s909_s27 }
  0xaf   : > { %v324_v23 = vpop.permute.xlu2 %323 }
  0xb7   : > { %v386_v24 = vpop.permute.xlu2 %385 }
  0xbf   : > { %v332_v27 = vpop.permute.xlu2 %331 }
  0xc6   : > { %v320_v25 = vpop.permute.xlu1 %319  ;;  %v316_v26 = vpop.permute.xlu0 %315 }
  0xc7   : > { %v398_v30 = vpop.permute.xlu2 %397  ;;  %v318_v39 = vadd.f32 %v316_v26, %v1051_v21  ;;  %v490_v26 = vld [vmem:[%s1105_s4 + $0x20] sm:$0x1] }
  0xc8   : > { %629 = vmatpush.msk.msra.mxu1 %vm495_vm3, %v490_v26 }
  0xc9   : > { %v322_v40 = vadd.f32 %v320_v25, %v318_v39  ;;  %v454_v25 = vld [vmem:[#allocation10] sm:$0xff] }
  0xcb   : > { %v326_v44 = vadd.f32 %v324_v23, %v322_v40  ;;  %v456_v23 = vld [vmem:[#allocation10 + $0x10] sm:$0x1f] }
  0xcc   : > { %627 = vmatpush.msk.msra.mxu0 %vm461_vm2, %v456_v23 }
  0xce   : > { %v382_v28 = vpop.permute.xlu1 %381  ;;  %v378_v29 = vpop.permute.xlu0 %377 }
  0xcf   : > { %v344_v33 = vpop.permute.xlu2 %343  ;;  %v380_v41 = vadd.f32 %v378_v29, %v375_v22 }
  0xd1   : > { %v384_v45 = vadd.f32 %v382_v28, %v380_v41  ;;  %v488_v28 = vld [vmem:[%s1105_s4 + $0x10] sm:$0xff] }
  0xd3   : > { %v388_v48 = vadd.f32 %v386_v24, %v384_v45  ;;  %v455_v24 = vld [vmem:[#allocation10 + $0x8] sm:$0xff] }
  0xd4   : > { %479 = vmatpush.msra.mxu0 %v455_v24 }
  0xd6   : > { %v390_v31 = vpop.permute.xlu1 %389  ;;  %v328_v32 = vpop.permute.xlu0 %327  ;;  %480 = vmatpush.msra.mxu0 %v454_v25 }
  0xd7   : > { %v410_v36 = vpop.permute.xlu2 %409  ;;  %v330_v47 = vadd.f32 %v328_v32, %v326_v44  ;;  %v392_v49 = vadd.f32 %v390_v31, %v388_v48  ;;  %v487_v32 = vld [vmem:[%s1105_s4 + $0x8] sm:$0xff] }
  0xd9   : > { %v334_v50 = vadd.f32 %v332_v27, %v330_v47  ;;  %v489_v27 = vld [vmem:[%s1105_s4 + $0x18] sm:$0xff] }
  0xda   : > { %511 = vmatpush.msra.mxu1 %v489_v27 }
  0xdc   : > { %512 = vmatpush.msra.mxu1 %v488_v28 }
  0xde   : > { %v336_v34 = vpop.permute.xlu1 %335  ;;  %v394_v35 = vpop.permute.xlu0 %393  ;;  %513 = vmatpush.msra.mxu1 %v487_v32 }
  0xdf   : > { %v356_v46 = vpop.permute.xlu2 %355  ;;  %v338_v53 = vadd.f32 %v336_v34, %v334_v50  ;;  %v396_v54 = vadd.f32 %v394_v35, %v392_v49 }
  0xe1   : > { %v400_v57 = vadd.f32 %v398_v30, %v396_v54 }
  0xe6   : > { %v402_v37 = vpop.permute.xlu1 %401  ;;  %v340_v38 = vpop.permute.xlu0 %339 }
  0xe7   : > { %v342_v55 = vadd.f32 %v340_v38, %v338_v53  ;;  %v422_v56 = vpop.permute.xlu2 %421  ;;  %v404_v58 = vadd.f32 %v402_v37, %v400_v57 }
  0xe9   : > { %v346_v59 = vadd.f32 %v344_v33, %v342_v55  ;;  %v486_v33 = vld [vmem:[%s1105_s4] sm:$0xff] }
  0xea   : > { %514 = vmatpush.msra.mxu1 %v486_v33 }
  0xee   : > { %v348_v42 = vpop.permute.xlu1 %347  ;;  %v406_v43 = vpop.permute.xlu0 %405 }
  0xef   : > { %v350_v62 = vadd.f32 %v348_v42, %v346_v59  ;;  %v408_v63 = vadd.f32 %v406_v43, %v404_v58  ;;  %v368_v2 = vpop.permute.xlu2 %367 }
  0xf1   : > { %v412_v1 = vadd.f32 %v410_v36, %v408_v63 }
  0xf6   : > { %v414_v51 = vpop.permute.xlu1 %413  ;;  %v352_v52 = vpop.permute.xlu0 %351 }
  0xf7   : > { %v354_v0 = vadd.f32 %v352_v52, %v350_v62  ;;  %v416_v3 = vadd.f32 %v414_v51, %v412_v1  ;;  %v434_v13 = vpop.permute.xlu2 %433 }
  0xf9   : > { %v358_v4 = vadd.f32 %v356_v46, %v354_v0 }
  0xfe   : > { %v360_v60 = vpop.permute.xlu1 %359  ;;  %v418_v61 = vpop.permute.xlu0 %417 }
  0xff   : > { %v362_v7 = vadd.f32 %v360_v60, %v358_v4  ;;  %v420_v8 = vadd.f32 %v418_v61, %v416_v3 }
 0x101   : > { %v424_v10 = vadd.f32 %v422_v56, %v420_v8 }
 0x106   : > { %v426_v5 = vpop.permute.xlu1 %425  ;;  %v364_v6 = vpop.permute.xlu0 %363 }
 0x107   : > { %v366_v9 = vadd.f32 %v364_v6, %v362_v7  ;;  %v428_v11 = vadd.f32 %v426_v5, %v424_v10 }
 0x109   : > { %v370_v12 = vadd.f32 %v368_v2, %v366_v9 }
 0x10e   : > { %v372_v14 = vpop.permute.xlu1 %371  ;;  %v430_v15 = vpop.permute.xlu0 %429 }
 0x10f   : > { %v374_v16 = vadd.f32 %v372_v14, %v370_v12  ;;  %v432_v17 = vadd.f32 %v430_v15, %v428_v11 }
 0x111   : > { %v437_v18 = vmul.f32 0.0012870013, %v374_v16  ;;  %v436_v19 = vadd.f32 %v434_v13, %v432_v17 }
 0x113   : > { %v439_v20 = vperm.slane %v437_v18, 0  ;;  %v445_v21 = vmul.f32 0.0033333334, %v436_v19 }
 0x115   : > { %v447_v22 = vperm.slane %v445_v21, 0  ;;  %440 = vrot.lane.b32.xlu0 %v439_v20, %s910_s26 }
 0x117   : > { %448 = vrot.lane.b32.xlu1 %v447_v22, %s911_s28 }
 0x187   : > { %v441_v29 = vpop.permute.xlu0 %440 }
 0x188   : > { %444 = vst.msk [vmem:[#allocation4] sm:$0x1] %vm443_vm4, %v441_v29 }
 0x189   : > { %v449_v30 = vpop.permute.xlu1 %448 }
 0x18a   : > { %452 = vst.msk [vmem:[#allocation4] sm:$0x1] %vm451_vm5, %v449_v30 }
 0x191   : > { %v453_v31 = vld [vmem:[#allocation4] sm:$0x1] }
 0x192   : > { %628 = vmatmul.msk.f32.vlgmr.msra.gmra.mxu0 %vm457_vm6, %v453_v31 }
 0x20f   : > { %v482_v34 = vpop.f32.mrf.mxu0 }
 0x210   : > { %v485_v35 = vmax.f32 %v482_v34, 0.0 }
 0x212   : > { %630 = vmatmul.msk.f32.vlgmr.msra.gmra.mxu1 %vm491_vm7, %v485_v35 }
 0x28f   : > { %v516_v36 = vpop.f32.mrf.mxu1 }
 0x290   : > { %520 = vst.msk [vmem:[#allocation11] sm:$0x1] %vm519_vm8, %v516_v36 }
 0x291 PF: > { %p665_p3 = scmp.eq.s32.totalorder %s967_s25, 6  ;;  %s912_s13 = smov [#allocation11]  }
 0x292   : > { %s527_s17 = sshll.u32 %s912_s13, 4  ;;  %s529_s22 = sshll.u32 %s1106_s5, 4  ;;  %s528_s17 = int_to_ptr.vmem [resolvable:$true] %s527_s17  ;;  %s530_s22 = int_to_ptr.hbm [resolvable:$true] %s529_s22 }
 0x293   : > { %646 = dma.vmem_to_hbm [thread:$0]  (%p665_p3), %s528_s17, 16, %s530_s22, [#allocation7]  }
 0x294   : > { %870 = dma.done.wait (%p665_p3), [#allocation7], 16  }
 0x295   : > { %872 = vsyncadd (%p665_p3), [#allocation7], 4294967280 }
 0x296 PF: > { %p17_p12 = scmp.ge.s32.totalorder %s985_s11, 9   ;;  %s1110_s18 = smov %s879_s19 }
 0x297   : > { %s1111_s19 = smov %s883_s20  ;;  %s1112_s20 = smov %s997_s14 }
 0x298   : > { %s1113_s21 = smov %s985_s11  ;;  %19 = sbr.rel (!%p17_p12) target bundleno = 5 (0x5), region = 97 }
 0x29d   :  { %543 = vsyncpa [#allocation6], 1 }
 0x29e   :  { %545 = vsyncpa [#allocation6 + $0x1], 1 }
 0x29f   :  { %546 = vsyncpa [#allocation9], 1 }
 0x2a0   :  { %548 = vsyncpa [#allocation9 + $0x1], 1 }
 0x2a1   :  { %549 = vsyncpa [#allocation7], 1 }
 0x2a2   :  { %551 = vsyncpa [#allocation7 + $0x1], 1 }

</bundles_post_ra>
